<compile_context>
chip_gen: v5e
topology: v5e:2x2
jax: 0.10.0
libtpu: 0.0.40
codegen_flags: <defaults>
</compile_context>

<pallas_src>
import functools
from typing import NamedTuple

import jax
import jax.numpy as jnp
from jax.experimental import pallas as pl
from jax.experimental.pallas import tpu as pltpu


def _round_up(x, m):
    return (x + m - 1) // m * m


def _vmem_capacity_bytes():
    # Generation-aware VMEM capacity (128 MiB on v5e/v6e, 64 MiB per TC on v7x).
    try:
        return int(pltpu.get_tpu_info().vmem_capacity_bytes)
    except Exception:
        return 64 * 2 ** 20  # conservative default (v7x per-TC)


class MlpParams(NamedTuple):
    w1: jax.Array          # (C_in_p, H_p)   bf16 (MXU dtype)
    b1: jax.Array          # (1, H_p)        f32
    w2: jax.Array          # (H_p, C_out_p)  bf16
    b2: jax.Array          # (1, C_out_p)    f32
    in_features: int
    hidden_features: int
    out_features: int


def prepare_mlp_params(w1, b1, w2, b2, *, compute_dtype=jnp.bfloat16):
    """Pad feature dims to lane multiples (128) and cast weights to the MXU dtype.

    Done ONCE at parameter-setup time (not per forward call) so the full weight
    matrices are not re-copied in HBM every forward.  Zero padding is exact for
    this MLP: padded hidden columns have zero weight+bias, GELU(0)=0 feeds zero
    rows of w2; padded in/out columns are zero / sliced off.
    """
    C_in, H = w1.shape
    H2, C_out = w2.shape
    assert H == H2 and b1.shape == (H,) and b2.shape == (C_out,)
    C_in_p, H_p, C_out_p = (_round_up(d, 128) for d in (C_in, H, C_out))
    w1p = jnp.pad(w1, ((0, C_in_p - C_in), (0, H_p - H))).astype(compute_dtype)
    w2p = jnp.pad(w2, ((0, H_p - H), (0, C_out_p - C_out))).astype(compute_dtype)
    b1p = jnp.pad(b1, (0, H_p - H)).astype(jnp.float32).reshape(1, H_p)
    b2p = jnp.pad(b2, (0, C_out_p - C_out)).astype(jnp.float32).reshape(1, C_out_p)
    return MlpParams(w1p, b1p, w2p, b2p, C_in, H, C_out)


def _mlp_kernel(x_ref, w1_ref, b1_ref, w2_ref, b2_ref, o_ref, *, h_chunk, approx_gelu):
    # Fused per row-tile:  o = GELU(x @ w1 + b1) @ w2 + b2
    # (Dropout(p=0.0) is the identity and is omitted.)
    H = w1_ref.shape[1]
    x = x_ref[...].astype(w1_ref.dtype)   # bf16 MXU inputs; VPU cast hidden under MXU
    acc = None
    # Hidden dim in lane-aligned chunks: bounds the f32 intermediate to
    # (tile_m, h_chunk).  Static Python loop -> fully unrolled (chunk count small).
    for lo in range(0, H, h_chunk):
        hi = min(lo + h_chunk, H)
        h = jnp.dot(x, w1_ref[:, lo:hi], preferred_element_type=jnp.float32)
        h = h + b1_ref[:, lo:hi]
        # tanh GELU -> EUP slot (free under MXU); approx_gelu=False = exact erf.
        h = jax.nn.gelu(h, approximate=approx_gelu)
        part = jnp.dot(h.astype(w2_ref.dtype), w2_ref[lo:hi, :],
                       preferred_element_type=jnp.float32)
        acc = part if acc is None else acc + part
    o_ref[...] = (acc + b2_ref[...]).astype(o_ref.dtype)


def mlp_pallas(x, params: MlpParams, *, tile_m=None, hidden_chunk=1024, approx_gelu=True):
    """x: (..., C_in) -> (..., C_out) using pre-padded/bf16 params."""
    *lead, C_in = x.shape
    assert C_in == params.in_features
    C_in_p, H_p = params.w1.shape
    C_out_p = params.w2.shape[1]
    C_out = params.out_features

    M = 1
    for d in lead:
        M *= d
    x2d = x.reshape(M, C_in)
    if C_in_p != C_in:
        x2d = jnp.pad(x2d, ((0, 0), (0, C_in_p - C_in)))

    vmem_cap = _vmem_capacity_bytes()
    vmem_budget = (vmem_cap * 7) // 8       # headroom for Mosaic internal scratch

    # Row tile: bigger on 128-MiB-VMEM parts (v5e/v6e), 512 on v7x (64 MiB/TC).
    if tile_m is None:
        tile_m = 1024 if vmem_cap > 96 * 2 ** 20 else 512
    tile_m = _round_up(max(16, min(int(tile_m), _round_up(M, 16))), 16)

    h_chunk = min(_round_up(max(int(hidden_chunk), 128), 128), H_p)

    act_bpe = x2d.dtype.itemsize
    out_bpe = x.dtype.itemsize
    w_bytes = (params.w1.size * params.w1.dtype.itemsize
               + params.w2.size * params.w2.dtype.itemsize
               + params.b1.size * 4 + params.b2.size * 4)

    def _vmem_estimate(tm):
        tile_io = tm * (C_in_p * act_bpe + C_out_p * out_bpe)   # x / out tiles
        interm = tm * (h_chunk + C_out_p) * 4                   # f32 hidden chunk + acc
        # 2x weights also covers the fallback (double-buffered weights) path.
        return 2 * w_bytes + 2 * tile_io + interm + 2 * 2 ** 20

    while tile_m > 64 and _vmem_estimate(tile_m) > vmem_budget:
        tile_m = _round_up(tile_m // 2, 16)

    M_p = _round_up(M, tile_m)
    if M_p != M:
        x2d = jnp.pad(x2d, ((0, M_p - M), (0, 0)))

    grid = (M_p // tile_m,)
    vmem_limit = int(min(max(_vmem_estimate(tile_m), 32 * 2 ** 20), vmem_budget))

    cost = pl.CostEstimate(
        flops=2 * M_p * (C_in_p * H_p + H_p * C_out_p),
        transcendentals=M_p * H_p,
        bytes_accessed=x2d.size * act_bpe + w_bytes + M_p * C_out_p * out_bpe)

    kernel = functools.partial(_mlp_kernel, h_chunk=h_chunk, approx_gelu=approx_gelu)

    def build(single_buffer_weights):
        if single_buffer_weights:
            # Constant-index weight/bias blocks stay VMEM-resident; single-buffer
            # them so they don't cost 2x VMEM (matters on v7x's 64 MiB/TC).
            resident = dict(pipeline_mode=pl.Buffered(1))
        else:
            resident = {}
        in_specs = [
            pl.BlockSpec((tile_m, C_in_p), lambda i: (i, 0)),            # x tile (pipelined)
            pl.BlockSpec((C_in_p, H_p), lambda i: (0, 0), **resident),   # w1 (resident)
            pl.BlockSpec((1, H_p), lambda i: (0, 0), **resident),        # b1
            pl.BlockSpec((H_p, C_out_p), lambda i: (0, 0), **resident),  # w2 (resident)
            pl.BlockSpec((1, C_out_p), lambda i: (0, 0), **resident),    # b2
        ]
        return pl.pallas_call(
            kernel,
            out_shape=jax.ShapeDtypeStruct((M_p, C_out_p), x.dtype),
            grid_spec=pltpu.PrefetchScalarGridSpec(
                num_scalar_prefetch=0,
                grid=grid,
                in_specs=in_specs,
                out_specs=pl.BlockSpec((tile_m, C_out_p), lambda i: (i, 0)),
            ),
            compiler_params=pltpu.CompilerParams(
                dimension_semantics=("parallel",),
                vmem_limit_bytes=vmem_limit,
            ),
            cost_estimate=cost,
        )

    args = (x2d, params.w1, params.b1, params.w2, params.b2)
    try:
        out2d = build(True)(*args)
    except Exception:
        # Fallback if this Pallas build rejects single-buffered constant blocks.
        out2d = build(False)(*args)

    out2d = out2d[:M, :C_out]
    return out2d.reshape(*lead, C_out)


# ---------------------------------------------------------------------------
# References
# ---------------------------------------------------------------------------
def mlp_reference_exact(x, w1, b1, w2, b2):
    # Literal torch Mlp semantics: f32, exact-erf GELU.
    h = jnp.einsum("...c,ch->...h", x, w1) + b1
    h = jax.nn.gelu(h, approximate=False)
    return jnp.einsum("...h,ho->...o", h, w2) + b2


def mlp_reference_matched(x, params: MlpParams, *, approx_gelu=True):
    # Same precision path as the kernel (bf16 MXU inputs, f32 accumulation).
    *lead, C_in = x.shape
    x2d = x.reshape(-1, C_in)
    x2d = jnp.pad(x2d, ((0, 0), (0, params.w1.shape[0] - C_in))).astype(params.w1.dtype)
    h = jnp.dot(x2d, params.w1, preferred_element_type=jnp.float32) + params.b1
    h = jax.nn.gelu(h, approximate=approx_gelu)
    o = jnp.dot(h.astype(params.w2.dtype), params.w2,
                preferred_element_type=jnp.float32) + params.b2
    o = o[:, :params.out_features].astype(x.dtype)
    return o.reshape(*lead, params.out_features)


def _make_params(key, in_features, hidden_features, out_features):
    k_w1, k_b1, k_w2, k_b2 = jax.random.split(key, 4)
    lim1 = 1.0 / (in_features ** 0.5)
    lim2 = 1.0 / (hidden_features ** 0.5)
    w1 = jax.random.uniform(k_w1, (in_features, hidden_features), jnp.float32, -lim1, lim1)
    b1 = jax.random.uniform(k_b1, (hidden_features,), jnp.float32, -lim1, lim1)
    w2 = jax.random.uniform(k_w2, (hidden_features, out_features), jnp.float32, -lim2, lim2)
    b2 = jax.random.uniform(k_b2, (out_features,), jnp.float32, -lim2, lim2)
    return w1, b1, w2, b2


if __name__ == "__main__":
    key = jax.random.PRNGKey(0)
    k1, k2, k3, k4, k5, k6 = jax.random.split(key, 6)

    # Test 1: small DeiT-like shapes (B, N, C) = (2, 8, 32), hidden=64, out=32.
    B, N, C_in, H, C_out = 2, 8, 32, 64, 32
    x = jax.random.normal(k1, (B, N, C_in), dtype=jnp.float32)
    w1, b1, w2, b2 = _make_params(k2, C_in, H, C_out)
    params = prepare_mlp_params(w1, b1, w2, b2)   # padding/cast hoisted out of the call

    out = jax.block_until_ready(mlp_pallas(x, params))
    assert out.shape == (B, N, C_out), out.shape
    ref_m = mlp_reference_matched(x, params)
    ref_e = mlp_reference_exact(x, w1, b1, w2, b2)
    assert jnp.allclose(out, ref_m, atol=5e-3, rtol=5e-3), float(jnp.max(jnp.abs(out - ref_m)))
    # bf16 MXU inputs + tanh GELU vs f32/erf torch reference -> relaxed tolerance.
    assert jnp.allclose(out, ref_e, atol=3e-2, rtol=3e-2), float(jnp.max(jnp.abs(out - ref_e)))

    # Test 2: ragged M and non-128 feature dims exercise the padding path.
    B2, N2, C_in2, H2, C_out2 = 3, 7, 48, 96, 40
    x2 = jax.random.normal(k3, (B2, N2, C_in2), dtype=jnp.float32)
    w1b, b1b, w2b, b2b = _make_params(k4, C_in2, H2, C_out2)
    params2 = prepare_mlp_params(w1b, b1b, w2b, b2b)

    out2 = jax.block_until_ready(mlp_pallas(x2, params2, tile_m=512))
    assert out2.shape == (B2, N2, C_out2), out2.shape
    ref2_m = mlp_reference_matched(x2, params2)
    ref2_e = mlp_reference_exact(x2, w1b, b1b, w2b, b2b)
    assert jnp.allclose(out2, ref2_m, atol=5e-3, rtol=5e-3), float(jnp.max(jnp.abs(out2 - ref2_m)))
    assert jnp.allclose(out2, ref2_e, atol=3e-2, rtol=3e-2), float(jnp.max(jnp.abs(out2 - ref2_e)))

    # Test 3: hidden-dim chunking path (H_p=256 split into two 128-lane chunks).
    B3, N3, C_in3, H3, C_out3 = 2, 8, 64, 256, 64
    x3 = jax.random.normal(k5, (B3, N3, C_in3), dtype=jnp.float32)
    w1c, b1c, w2c, b2c = _make_params(k6, C_in3, H3, C_out3)
    params3 = prepare_mlp_params(w1c, b1c, w2c, b2c)

    out3 = jax.block_until_ready(mlp_pallas(x3, params3, hidden_chunk=128))
    assert out3.shape == (B3, N3, C_out3), out3.shape
    ref3_m = mlp_reference_matched(x3, params3)
    ref3_e = mlp_reference_exact(x3, w1c, b1c, w2c, b2c)
    assert jnp.allclose(out3, ref3_m, atol=5e-3, rtol=5e-3), float(jnp.max(jnp.abs(out3 - ref3_m)))
    assert jnp.allclose(out3, ref3_e, atol=3e-2, rtol=3e-2), float(jnp.max(jnp.abs(out3 - ref3_e)))

    print("KERNEL_OK")
</pallas_src>

<mosaic_0001>
module attributes {stable_mosaic.version = 11 : i64} {
  func.func @_mlp_kernel(%arg0: i32, %arg1: memref<16x128xf32, #tpu.memory_space<vmem>>, %arg2: memref<128x128xbf16, #tpu.memory_space<vmem>>, %arg3: memref<1x128xf32, #tpu.memory_space<vmem>>, %arg4: memref<128x128xbf16, #tpu.memory_space<vmem>>, %arg5: memref<1x128xf32, #tpu.memory_space<vmem>>, %arg6: memref<16x128xf32, #tpu.memory_space<vmem>>) attributes {dimension_semantics = [#tpu.dimension_semantics<parallel>], iteration_bounds = array<i64: 1>, scalar_prefetch = 0 : i64, scratch_operands = 0 : i64, tpu.core_type = #tpu.core_type<tc>, window_params = [{transform_indices = @transform_0, window_bounds = array<i64: 16, 128>}, {pipeline_mode = #tpu.pipeline_mode<synchronous>, transform_indices = @transform_1, window_bounds = array<i64: 128, 128>}, {pipeline_mode = #tpu.pipeline_mode<synchronous>, transform_indices = @transform_2, window_bounds = array<i64: 1, 128>}, {pipeline_mode = #tpu.pipeline_mode<synchronous>, transform_indices = @transform_3, window_bounds = array<i64: 128, 128>}, {pipeline_mode = #tpu.pipeline_mode<synchronous>, transform_indices = @transform_4, window_bounds = array<i64: 1, 128>}, {transform_indices = @transform_5, window_bounds = array<i64: 16, 128>}]} {
    %c0 = arith.constant 0 : index
    %c0_0 = arith.constant 0 : index
    %0 = vector.load %arg1[%c0, %c0_0] : memref<16x128xf32, #tpu.memory_space<vmem>>, vector<16x128xf32>
    %1 = arith.truncf %0 : vector<16x128xf32> to vector<16x128xbf16>
    %c0_1 = arith.constant 0 : index
    %c0_2 = arith.constant 0 : index
    %2 = vector.load %arg2[%c0_1, %c0_2] : memref<128x128xbf16, #tpu.memory_space<vmem>>, vector<128x128xbf16>
    %cst = arith.constant dense<0.000000e+00> : vector<16x128xf32>
    %3 = tpu.matmul %1, %2, %cst {dimension_numbers = #tpu.dot_dimension_numbers<[1], [0], [0], [1], [0, 0, 1, 1], [], []>} : vector<16x128xbf16>, vector<128x128xbf16>, vector<16x128xf32> -> vector<16x128xf32>
    %c0_3 = arith.constant 0 : index
    %c0_4 = arith.constant 0 : index
    %4 = vector.load %arg3[%c0_3, %c0_4] : memref<1x128xf32, #tpu.memory_space<vmem>>, vector<1x128xf32>
    %5 = vector.broadcast %4 : vector<1x128xf32> to vector<16x128xf32>
    %6 = arith.addf %3, %5 : vector<16x128xf32>
    %7 = arith.mulf %6, %6 : vector<16x128xf32>
    %8 = arith.mulf %6, %7 : vector<16x128xf32>
    %cst_5 = arith.constant 4.471500e-02 : f32
    %9 = vector.broadcast %cst_5 : f32 to vector<16x128xf32>
    %10 = arith.mulf %9, %8 : vector<16x128xf32>
    %11 = arith.addf %6, %10 : vector<16x128xf32>
    %cst_6 = arith.constant 0.797884583 : f32
    %12 = vector.broadcast %cst_6 : f32 to vector<16x128xf32>
    %13 = arith.mulf %12, %11 : vector<16x128xf32>
    %14 = math.tanh %13 : vector<16x128xf32>
    %cst_7 = arith.constant 1.000000e+00 : f32
    %15 = vector.broadcast %cst_7 : f32 to vector<16x128xf32>
    %16 = arith.addf %15, %14 : vector<16x128xf32>
    %cst_8 = arith.constant 5.000000e-01 : f32
    %17 = vector.broadcast %cst_8 : f32 to vector<16x128xf32>
    %18 = arith.mulf %17, %16 : vector<16x128xf32>
    %19 = arith.mulf %6, %18 : vector<16x128xf32>
    %20 = arith.truncf %19 : vector<16x128xf32> to vector<16x128xbf16>
    %c0_9 = arith.constant 0 : index
    %c0_10 = arith.constant 0 : index
    %21 = vector.load %arg4[%c0_9, %c0_10] : memref<128x128xbf16, #tpu.memory_space<vmem>>, vector<128x128xbf16>
    %cst_11 = arith.constant dense<0.000000e+00> : vector<16x128xf32>
    %22 = tpu.matmul %20, %21, %cst_11 {dimension_numbers = #tpu.dot_dimension_numbers<[1], [0], [0], [1], [0, 0, 1, 1], [], []>} : vector<16x128xbf16>, vector<128x128xbf16>, vector<16x128xf32> -> vector<16x128xf32>
    %c0_12 = arith.constant 0 : index
    %c0_13 = arith.constant 0 : index
    %23 = vector.load %arg5[%c0_12, %c0_13] : memref<1x128xf32, #tpu.memory_space<vmem>>, vector<1x128xf32>
    %24 = vector.broadcast %23 : vector<1x128xf32> to vector<16x128xf32>
    %25 = arith.addf %22, %24 : vector<16x128xf32>
    %c0_14 = arith.constant 0 : index
    %c0_15 = arith.constant 0 : index
    %26 = vector.load %arg6[%c0_14, %c0_15] : memref<16x128xf32, #tpu.memory_space<vmem>>, vector<16x128xf32>
    tpu.vector_store %arg6[%c0_14, %c0_15], %25 {strides = array<i32>} : memref<16x128xf32, #tpu.memory_space<vmem>>, vector<16x128xf32>,
    return
  }
  func.func @transform_0(%arg0: i32) -> (i32, i32) {
    %c0_i32 = arith.constant 0 : i32
    %c0_i32_0 = arith.constant 0 : i32
    return %arg0, %c0_i32 : i32, i32
  }
  func.func @transform_1(%arg0: i32) -> (i32, i32) {
    %c0_i32 = arith.constant 0 : i32
    %c0_i32_0 = arith.constant 0 : i32
    %c0_i32_1 = arith.constant 0 : i32
    return %c0_i32, %c0_i32_0 : i32, i32
  }
  func.func @transform_2(%arg0: i32) -> (i32, i32) {
    %c0_i32 = arith.constant 0 : i32
    %c0_i32_0 = arith.constant 0 : i32
    %c0_i32_1 = arith.constant 0 : i32
    return %c0_i32, %c0_i32_0 : i32, i32
  }
  func.func @transform_3(%arg0: i32) -> (i32, i32) {
    %c0_i32 = arith.constant 0 : i32
    %c0_i32_0 = arith.constant 0 : i32
    %c0_i32_1 = arith.constant 0 : i32
    return %c0_i32, %c0_i32_0 : i32, i32
  }
  func.func @transform_4(%arg0: i32) -> (i32, i32) {
    %c0_i32 = arith.constant 0 : i32
    %c0_i32_0 = arith.constant 0 : i32
    %c0_i32_1 = arith.constant 0 : i32
    return %c0_i32, %c0_i32_0 : i32, i32
  }
  func.func @transform_5(%arg0: i32) -> (i32, i32) {
    %c0_i32 = arith.constant 0 : i32
    %c0_i32_0 = arith.constant 0 : i32
    return %arg0, %c0_i32 : i32, i32
  }
}

module attributes {stable_mosaic.version = 11 : i64} {
  func.func @_mlp_kernel(%arg0: i32, %arg1: memref<16x128xf32, #tpu.memory_space<vmem>>, %arg2: memref<128x128xbf16, #tpu.memory_space<vmem>>, %arg3: memref<1x128xf32, #tpu.memory_space<vmem>>, %arg4: memref<128x128xbf16, #tpu.memory_space<vmem>>, %arg5: memref<1x128xf32, #tpu.memory_space<vmem>>, %arg6: memref<16x128xf32, #tpu.memory_space<vmem>>) attributes {dimension_semantics = [#tpu.dimension_semantics<parallel>], iteration_bounds = array<i64: 1>, scalar_prefetch = 0 : i64, scratch_operands = 0 : i64, tpu.core_type = #tpu.core_type<tc>, window_params = [{transform_indices = @transform_0, window_bounds = array<i64: 16, 128>}, {pipeline_mode = #tpu.pipeline_mode<synchronous>, transform_indices = @transform_1, window_bounds = array<i64: 128, 128>}, {pipeline_mode = #tpu.pipeline_mode<synchronous>, transform_indices = @transform_2, window_bounds = array<i64: 1, 128>}, {pipeline_mode = #tpu.pipeline_mode<synchronous>, transform_indices = @transform_3, window_bounds = array<i64: 128, 128>}, {pipeline_mode = #tpu.pipeline_mode<synchronous>, transform_indices = @transform_4, window_bounds = array<i64: 1, 128>}, {transform_indices = @transform_5, window_bounds = array<i64: 16, 128>}]} {
    %c0 = arith.constant 0 : index
    %c0_0 = arith.constant 0 : index
    %0 = vector.load %arg1[%c0, %c0_0] : memref<16x128xf32, #tpu.memory_space<vmem>>, vector<16x128xf32>
    %1 = arith.truncf %0 : vector<16x128xf32> to vector<16x128xbf16>
    %c0_1 = arith.constant 0 : index
    %c0_2 = arith.constant 0 : index
    %2 = vector.load %arg2[%c0_1, %c0_2] : memref<128x128xbf16, #tpu.memory_space<vmem>>, vector<128x128xbf16>
    %cst = arith.constant dense<0.000000e+00> : vector<16x128xf32>
    %3 = tpu.matmul %1, %2, %cst {dimension_numbers = #tpu.dot_dimension_numbers<[1], [0], [0], [1], [0, 0, 1, 1], [], []>} : vector<16x128xbf16>, vector<128x128xbf16>, vector<16x128xf32> -> vector<16x128xf32>
    %c0_3 = arith.constant 0 : index
    %c0_4 = arith.constant 0 : index
    %4 = vector.load %arg3[%c0_3, %c0_4] : memref<1x128xf32, #tpu.memory_space<vmem>>, vector<1x128xf32>
    %5 = vector.broadcast %4 : vector<1x128xf32> to vector<16x128xf32>
    %6 = arith.addf %3, %5 : vector<16x128xf32>
    %7 = arith.mulf %6, %6 : vector<16x128xf32>
    %8 = arith.mulf %6, %7 : vector<16x128xf32>
    %cst_5 = arith.constant 4.471500e-02 : f32
    %9 = vector.broadcast %cst_5 : f32 to vector<16x128xf32>
    %10 = arith.mulf %9, %8 : vector<16x128xf32>
    %11 = arith.addf %6, %10 : vector<16x128xf32>
    %cst_6 = arith.constant 0.797884583 : f32
    %12 = vector.broadcast %cst_6 : f32 to vector<16x128xf32>
    %13 = arith.mulf %12, %11 : vector<16x128xf32>
    %14 = math.tanh %13 : vector<16x128xf32>
    %cst_7 = arith.constant 1.000000e+00 : f32
    %15 = vector.broadcast %cst_7 : f32 to vector<16x128xf32>
    %16 = arith.addf %15, %14 : vector<16x128xf32>
    %cst_8 = arith.constant 5.000000e-01 : f32
    %17 = vector.broadcast %cst_8 : f32 to vector<16x128xf32>
    %18 = arith.mulf %17, %16 : vector<16x128xf32>
    %19 = arith.mulf %6, %18 : vector<16x128xf32>
    %20 = arith.truncf %19 : vector<16x128xf32> to vector<16x128xbf16>
    %c0_9 = arith.constant 0 : index
    %c0_10 = arith.constant 0 : index
    %21 = vector.load %arg4[%c0_9, %c0_10] : memref<128x128xbf16, #tpu.memory_space<vmem>>, vector<128x128xbf16>
    %cst_11 = arith.constant dense<0.000000e+00> : vector<16x128xf32>
    %22 = tpu.matmul %20, %21, %cst_11 {dimension_numbers = #tpu.dot_dimension_numbers<[1], [0], [0], [1], [0, 0, 1, 1], [], []>} : vector<16x128xbf16>, vector<128x128xbf16>, vector<16x128xf32> -> vector<16x128xf32>
    %c0_12 = arith.constant 0 : index
    %c0_13 = arith.constant 0 : index
    %23 = vector.load %arg5[%c0_12, %c0_13] : memref<1x128xf32, #tpu.memory_space<vmem>>, vector<1x128xf32>
    %24 = vector.broadcast %23 : vector<1x128xf32> to vector<16x128xf32>
    %25 = arith.addf %22, %24 : vector<16x128xf32>
    %c0_14 = arith.constant 0 : index
    %c0_15 = arith.constant 0 : index
    %26 = vector.load %arg6[%c0_14, %c0_15] : memref<16x128xf32, #tpu.memory_space<vmem>>, vector<16x128xf32>
    tpu.vector_store %arg6[%c0_14, %c0_15], %25 {strides = array<i32>} : memref<16x128xf32, #tpu.memory_space<vmem>>, vector<16x128xf32>,
    return
  }
  func.func @transform_0(%arg0: i32) -> (i32, i32) {
    %c0_i32 = arith.constant 0 : i32
    %c0_i32_0 = arith.constant 0 : i32
    return %arg0, %c0_i32 : i32, i32
  }
  func.func @transform_1(%arg0: i32) -> (i32, i32) {
    %c0_i32 = arith.constant 0 : i32
    %c0_i32_0 = arith.constant 0 : i32
    %c0_i32_1 = arith.constant 0 : i32
    return %c0_i32, %c0_i32_0 : i32, i32
  }
  func.func @transform_2(%arg0: i32) -> (i32, i32) {
    %c0_i32 = arith.constant 0 : i32
    %c0_i32_0 = arith.constant 0 : i32
    %c0_i32_1 = arith.constant 0 : i32
    return %c0_i32, %c0_i32_0 : i32, i32
  }
  func.func @transform_3(%arg0: i32) -> (i32, i32) {
    %c0_i32 = arith.constant 0 : i32
    %c0_i32_0 = arith.constant 0 : i32
    %c0_i32_1 = arith.constant 0 : i32
    return %c0_i32, %c0_i32_0 : i32, i32
  }
  func.func @transform_4(%arg0: i32) -> (i32, i32) {
    %c0_i32 = arith.constant 0 : i32
    %c0_i32_0 = arith.constant 0 : i32
    %c0_i32_1 = arith.constant 0 : i32
    return %c0_i32, %c0_i32_0 : i32, i32
  }
  func.func @transform_5(%arg0: i32) -> (i32, i32) {
    %c0_i32 = arith.constant 0 : i32
    %c0_i32_0 = arith.constant 0 : i32
    return %arg0, %c0_i32 : i32, i32
  }
}

</mosaic_0001>

<bundles_post_ra>
// kernel: tpu_custom_call.1
= control target key start
LH: loop header
LB: loop body
LE: loop exit
PB: predicated region body
PF: predicated region fallthrough
CT: control target
= control target key end

     0   :  { %10 = vsyncpa [#allocation3], 0  ;;  %s534_s0 = inlined_call_operand.hbm [shape: f32[16,128], index: 0, kind: input, shape index: {}]   ;;  %s535_s1 = inlined_call_operand.hbm [shape: bf16[128,128], index: 1, kind: input, shape index: {}]   ;;  %s536_s2 = inlined_call_operand.vmem [shape: f32[1,128], index: 2, kind: input, shape index: {}]   ;;  %s537_s3 = inlined_call_operand.hbm [shape: bf16[128,128], index: 3, kind: input, shape index: {}]   ;;  %s538_s4 = inlined_call_operand.vmem [shape: f32[1,128], index: 4, kind: input, shape index: {}]   ;;  %s539_s5 = inlined_call_operand.hbm [shape: f32[16,128], index: 5, kind: output, shape index: {}]  }
   0x1   :  { %11 = vsyncpa [#allocation6], 0  ;;  %s30_s20 = sshll.u32 %s535_s1, 4  ;;  %s31_s20 = int_to_ptr.hbm [resolvable:$true] %s30_s20 }
   0x2   :  { %12 = vsyncpa [#allocation4], 0  ;;  %s472_s21 = smov [#allocation5]   ;;  %s17_s25 = sshll.u32 %s534_s0, 4  ;;  %s18_s25 = int_to_ptr.hbm [resolvable:$true] %s17_s25 }
   0x3   :  { %s32_s22 = sshll.u32 %s472_s21, 4  ;;  %s473_s26 = smov 64   ;;  %s33_s22 = int_to_ptr.vmem [resolvable:$true] %s32_s22 }
   0x4   :  { %s474_s27 = smov 4   ;;  %s475_s28 = smov [#allocation2]  }
   0x5   :  { %38 = dma.hbm_to_vmem [thread:$0]  %s31_s20, 1024, %s33_s22, [#allocation6], %s473_s26, %s473_s26, %s474_s27  }
   0x6   :  { %s19_s29 = sshll.u32 %s475_s28, 4  ;;  %s476_s30 = smov 128   ;;  %s20_s29 = int_to_ptr.vmem [resolvable:$true] %s19_s29 }
   0x7   :  { %s477_s6 = smov 8   ;;  %s45_s8 = sshll.u32 %s537_s3, 4  ;;  %s46_s8 = int_to_ptr.hbm [resolvable:$true] %s45_s8 }
   0x8   :  { %25 = dma.hbm_to_vmem [thread:$0]  %s18_s25, 256, %s20_s29, [#allocation3], %s476_s30, %s476_s30, %s477_s6  }
   0x9   :  { %s478_s9 = smov [#allocation7]  }
   0xa   :  { %s47_s0 = sshll.u32 %s478_s9, 4  ;;  %s48_s0 = int_to_ptr.vmem [resolvable:$true] %s47_s0 }
   0xb   :  { %53 = dma.hbm_to_vmem [thread:$0]  %s46_s8, 1024, %s48_s0, [#allocation6], %s473_s26, %s473_s26, %s474_s27  }
   0xc   :  { %466 = dma.done.wait [#allocation3], 256  }
   0xd   :  { %467 = vsyncadd [#allocation3], 4294967040 }
   0xe   :  { %468 = dma.done.wait [#allocation6], 2048  }
   0xf   :  { %469 = vsyncadd [#allocation6], 4294965248  ;;  %v347_v0 = vld [vmem:[#allocation5 + $0x38] sm:$0xff]  ;;  %v346_v1 = vld [vmem:[#allocation5 + $0x30] sm:$0xff]  ;;  %s479_s12 = smov [#allocation8]   ;;  %s262_s16 = sshll.u32 %s539_s5, 4  ;;  %s263_s16 = int_to_ptr.hbm [resolvable:$true] %s262_s16 }
  0x10   :  { %139 = vmatpush.bf16.msra.mxu0 %v347_v0  ;;  %v345_v2 = vld [vmem:[#allocation5 + $0x28] sm:$0xff]  ;;  %v344_v3 = vld [vmem:[#allocation5 + $0x20] sm:$0xff]  ;;  %v343_v4 = vld [vmem:[#allocation5 + $0x18] sm:$0xff]  ;;  %s260_s13 = sshll.u32 %s479_s12, 4  ;;  %s261_s13 = int_to_ptr.vmem [resolvable:$true] %s260_s13 }
  0x11   :  { %v342_v5 = vld [vmem:[#allocation5 + $0x10] sm:$0xff]  ;;  %v341_v6 = vld [vmem:[#allocation5 + $0x8] sm:$0xff]  ;;  %v340_v7 = vld [vmem:[#allocation5] sm:$0xff] }
  0x12   :  { %v68_v8 = vld [vmem:[#allocation2] sm:$0xff]  ;;  %v69_v9 = vld [vmem:[#allocation2 + $0x8] sm:$0xff]  ;;  %v353_v13 = vld [vmem:[#allocation7 + $0x28] sm:$0xff] }
  0x13   :  { %v70_v10 = vpack.c.bf16 %v69_v9, %v68_v8  ;;  %v355_v11 = vld [vmem:[#allocation7 + $0x38] sm:$0xff]  ;;  %v354_v12 = vld [vmem:[#allocation7 + $0x30] sm:$0xff]  ;;  %v352_v14 = vld [vmem:[#allocation7 + $0x20] sm:$0xff] }
  0x14   :  { %140 = vmatpush.bf16.msra.mxu0 %v346_v1  ;;  %240 = vmatpush.bf16.msra.mxu1 %v355_v11  ;;  %v351_v15 = vld [vmem:[#allocation7 + $0x18] sm:$0xff]  ;;  %v350_v16 = vld [vmem:[#allocation7 + $0x10] sm:$0xff]  ;;  %v349_v17 = vld [vmem:[#allocation7 + $0x8] sm:$0xff] }
  0x15   :  { %v364_v18 = vld [vmem:[%s536_s2] ss:$0 sm:$0xff]  ;;  %v348_v19 = vld [vmem:[#allocation7] sm:$0xff] }
  0x16   :  { %v365_v43 = vld [vmem:[%s538_s4] ss:$0 sm:$0xff] }
  0x18   :  { %141 = vmatpush.bf16.msra.mxu0 %v345_v2  ;;  %241 = vmatpush.bf16.msra.mxu1 %v354_v12 }
  0x1c   :  { %142 = vmatpush.bf16.msra.mxu0 %v344_v3  ;;  %242 = vmatpush.bf16.msra.mxu1 %v353_v13 }
  0x20   :  { %143 = vmatpush.bf16.msra.mxu0 %v343_v4  ;;  %243 = vmatpush.bf16.msra.mxu1 %v352_v14 }
  0x24   :  { %144 = vmatpush.bf16.msra.mxu0 %v342_v5  ;;  %244 = vmatpush.bf16.msra.mxu1 %v351_v15 }
  0x28   :  { %145 = vmatpush.bf16.msra.mxu0 %v341_v6  ;;  %245 = vmatpush.bf16.msra.mxu1 %v350_v16 }
  0x2c   :  { %146 = vmatpush.bf16.msra.mxu0 %v340_v7  ;;  %246 = vmatpush.bf16.msra.mxu1 %v349_v17 }
  0x2f   :  { %147 = vmatmul.bf16.vlgmr.msra.gmra.mxu0 %v70_v10 }
  0x30   :  { %247 = vmatpush.bf16.msra.mxu1 %v348_v19 }
  0xac   :  { %v148_v20 = vpop.f32.mrf.mxu0 }
  0xad   :  { %v149_v21 = vadd.f32 %v364_v18, %v148_v20 }
  0xaf   :  { %v153_v22 = vmul.f32 %v149_v21, %v149_v21 }
  0xb1   :  { %v155_v23 = vmul.f32 %v153_v22, %v149_v21 }
  0xb3   :  { %v157_v24 = vmul.f32 0.044715, %v155_v23 }
  0xb4   :  { %v150_v25 = vpop.f32.mrf.mxu0 }
  0xb5   :  { %v159_v26 = vadd.f32 %v157_v24, %v149_v21  ;;  %v151_v27 = vadd.f32 %v364_v18, %v150_v25 }
  0xb7   :  { %v154_v28 = vmul.f32 %v151_v27, %v151_v27  ;;  %v161_v29 = vmul.f32 0.7978846, %v159_v26 }
  0xb9   :  { %v156_v30 = vmul.f32 %v154_v28, %v151_v27  ;;  %366 = vtanh.f32 %v161_v29 }
  0xbb   :  { %v158_v31 = vmul.f32 0.044715, %v156_v30 }
  0xbd   :  { %v160_v32 = vadd.f32 %v158_v31, %v151_v27 }
  0xbf   :  { %v162_v33 = vmul.f32 0.7978846, %v160_v32  ;;  %v367_v34 = vpop.eup %366 }
  0xc0   :  { %v165_v35 = vadd.f32 1.0, %v367_v34 }
  0xc1   :  { %368 = vtanh.f32 %v162_v33 }
  0xc2   :  { %v167_v38 = vmul.f32 0.5, %v165_v35 }
  0xc4   :  { %v169_v40 = vmul.f32 %v167_v38, %v149_v21 }
  0xc7   :  { %v369_v36 = vpop.eup %368 }
  0xc8   :  { %v166_v37 = vadd.f32 1.0, %v369_v36 }
  0xca   :  { %v168_v39 = vmul.f32 0.5, %v166_v37 }
  0xcc   :  { %v170_v41 = vmul.f32 %v168_v39, %v151_v27 }
  0xce   :  { %v171_v42 = vpack.c.bf16 %v170_v41, %v169_v40 }
  0xd0   :  { %248 = vmatmul.bf16.vlgmr.msra.gmra.mxu1 %v171_v42 }
 0x14d   :  { %v249_v44 = vpop.f32.mrf.mxu1 }
 0x14e   :  { %v250_v45 = vadd.f32 %v365_v43, %v249_v44 }
 0x150   :  { %254 = vst [vmem:[#allocation8] sm:$0xff] %v250_v45 }
 0x155   :  { %v251_v46 = vpop.f32.mrf.mxu1 }
 0x156   :  { %v252_v47 = vadd.f32 %v365_v43, %v251_v46 }
 0x158   :  { %255 = vst [vmem:[#allocation8 + $0x8] sm:$0xff] %v252_v47 }
 0x159   :  { %268 = dma.vmem_to_hbm [thread:$0]  %s261_s13, 256, %s263_s16, [#allocation4], %s476_s30, %s476_s30, %s477_s6  }
 0x15a   :  { %470 = dma.done.wait [#allocation4], 256  }
 0x15b   :  { %471 = vsyncadd [#allocation4], 4294967040 }
 0x15c   :  { %273 = vsyncpa [#allocation3], 1 }
 0x15d   :  { %274 = vsyncpa [#allocation6], 1 }
 0x15e   :  { %275 = vsyncpa [#allocation4], 1 }

// kernel: tpu_custom_call.1
= control target key start
LH: loop header
LB: loop body
LE: loop exit
PB: predicated region body
PF: predicated region fallthrough
CT: control target
= control target key end

     0   :  { %10 = vsyncpa [#allocation3], 0  ;;  %s534_s0 = inlined_call_operand.hbm [shape: f32[16,128], index: 0, kind: input, shape index: {}]   ;;  %s535_s1 = inlined_call_operand.hbm [shape: bf16[128,128], index: 1, kind: input, shape index: {}]   ;;  %s536_s2 = inlined_call_operand.vmem [shape: f32[1,128], index: 2, kind: input, shape index: {}]   ;;  %s537_s3 = inlined_call_operand.hbm [shape: bf16[128,128], index: 3, kind: input, shape index: {}]   ;;  %s538_s4 = inlined_call_operand.vmem [shape: f32[1,128], index: 4, kind: input, shape index: {}]   ;;  %s539_s5 = inlined_call_operand.hbm [shape: f32[16,128], index: 5, kind: output, shape index: {}]  }
   0x1   :  { %11 = vsyncpa [#allocation6], 0  ;;  %s30_s20 = sshll.u32 %s535_s1, 4  ;;  %s31_s20 = int_to_ptr.hbm [resolvable:$true] %s30_s20 }
   0x2   :  { %12 = vsyncpa [#allocation4], 0  ;;  %s472_s21 = smov [#allocation5]   ;;  %s17_s25 = sshll.u32 %s534_s0, 4  ;;  %s18_s25 = int_to_ptr.hbm [resolvable:$true] %s17_s25 }
   0x3   :  { %s32_s22 = sshll.u32 %s472_s21, 4  ;;  %s473_s26 = smov 64   ;;  %s33_s22 = int_to_ptr.vmem [resolvable:$true] %s32_s22 }
   0x4   :  { %s474_s27 = smov 4   ;;  %s475_s28 = smov [#allocation2]  }
   0x5   :  { %38 = dma.hbm_to_vmem [thread:$0]  %s31_s20, 1024, %s33_s22, [#allocation6], %s473_s26, %s473_s26, %s474_s27  }
   0x6   :  { %s19_s29 = sshll.u32 %s475_s28, 4  ;;  %s476_s30 = smov 128   ;;  %s20_s29 = int_to_ptr.vmem [resolvable:$true] %s19_s29 }
   0x7   :  { %s477_s6 = smov 8   ;;  %s45_s8 = sshll.u32 %s537_s3, 4  ;;  %s46_s8 = int_to_ptr.hbm [resolvable:$true] %s45_s8 }
   0x8   :  { %25 = dma.hbm_to_vmem [thread:$0]  %s18_s25, 256, %s20_s29, [#allocation3], %s476_s30, %s476_s30, %s477_s6  }
   0x9   :  { %s478_s9 = smov [#allocation7]  }
   0xa   :  { %s47_s0 = sshll.u32 %s478_s9, 4  ;;  %s48_s0 = int_to_ptr.vmem [resolvable:$true] %s47_s0 }
   0xb   :  { %53 = dma.hbm_to_vmem [thread:$0]  %s46_s8, 1024, %s48_s0, [#allocation6], %s473_s26, %s473_s26, %s474_s27  }
   0xc   :  { %466 = dma.done.wait [#allocation3], 256  }
   0xd   :  { %467 = vsyncadd [#allocation3], 4294967040 }
   0xe   :  { %468 = dma.done.wait [#allocation6], 2048  }
   0xf   :  { %469 = vsyncadd [#allocation6], 4294965248  ;;  %v347_v0 = vld [vmem:[#allocation5 + $0x38] sm:$0xff]  ;;  %v346_v1 = vld [vmem:[#allocation5 + $0x30] sm:$0xff]  ;;  %s479_s12 = smov [#allocation8]   ;;  %s262_s16 = sshll.u32 %s539_s5, 4  ;;  %s263_s16 = int_to_ptr.hbm [resolvable:$true] %s262_s16 }
  0x10   :  { %139 = vmatpush.bf16.msra.mxu0 %v347_v0  ;;  %v345_v2 = vld [vmem:[#allocation5 + $0x28] sm:$0xff]  ;;  %v344_v3 = vld [vmem:[#allocation5 + $0x20] sm:$0xff]  ;;  %v343_v4 = vld [vmem:[#allocation5 + $0x18] sm:$0xff]  ;;  %s260_s13 = sshll.u32 %s479_s12, 4  ;;  %s261_s13 = int_to_ptr.vmem [resolvable:$true] %s260_s13 }
  0x11   :  { %v342_v5 = vld [vmem:[#allocation5 + $0x10] sm:$0xff]  ;;  %v341_v6 = vld [vmem:[#allocation5 + $0x8] sm:$0xff]  ;;  %v340_v7 = vld [vmem:[#allocation5] sm:$0xff] }
  0x12   :  { %v68_v8 = vld [vmem:[#allocation2] sm:$0xff]  ;;  %v69_v9 = vld [vmem:[#allocation2 + $0x8] sm:$0xff]  ;;  %v353_v13 = vld [vmem:[#allocation7 + $0x28] sm:$0xff] }
  0x13   :  { %v70_v10 = vpack.c.bf16 %v69_v9, %v68_v8  ;;  %v355_v11 = vld [vmem:[#allocation7 + $0x38] sm:$0xff]  ;;  %v354_v12 = vld [vmem:[#allocation7 + $0x30] sm:$0xff]  ;;  %v352_v14 = vld [vmem:[#allocation7 + $0x20] sm:$0xff] }
  0x14   :  { %140 = vmatpush.bf16.msra.mxu0 %v346_v1  ;;  %240 = vmatpush.bf16.msra.mxu1 %v355_v11  ;;  %v351_v15 = vld [vmem:[#allocation7 + $0x18] sm:$0xff]  ;;  %v350_v16 = vld [vmem:[#allocation7 + $0x10] sm:$0xff]  ;;  %v349_v17 = vld [vmem:[#allocation7 + $0x8] sm:$0xff] }
  0x15   :  { %v364_v18 = vld [vmem:[%s536_s2] ss:$0 sm:$0xff]  ;;  %v348_v19 = vld [vmem:[#allocation7] sm:$0xff] }
  0x16   :  { %v365_v43 = vld [vmem:[%s538_s4] ss:$0 sm:$0xff] }
  0x18   :  { %141 = vmatpush.bf16.msra.mxu0 %v345_v2  ;;  %241 = vmatpush.bf16.msra.mxu1 %v354_v12 }
  0x1c   :  { %142 = vmatpush.bf16.msra.mxu0 %v344_v3  ;;  %242 = vmatpush.bf16.msra.mxu1 %v353_v13 }
  0x20   :  { %143 = vmatpush.bf16.msra.mxu0 %v343_v4  ;;  %243 = vmatpush.bf16.msra.mxu1 %v352_v14 }
  0x24   :  { %144 = vmatpush.bf16.msra.mxu0 %v342_v5  ;;  %244 = vmatpush.bf16.msra.mxu1 %v351_v15 }
  0x28   :  { %145 = vmatpush.bf16.msra.mxu0 %v341_v6  ;;  %245 = vmatpush.bf16.msra.mxu1 %v350_v16 }
  0x2c   :  { %146 = vmatpush.bf16.msra.mxu0 %v340_v7  ;;  %246 = vmatpush.bf16.msra.mxu1 %v349_v17 }
  0x2f   :  { %147 = vmatmul.bf16.vlgmr.msra.gmra.mxu0 %v70_v10 }
  0x30   :  { %247 = vmatpush.bf16.msra.mxu1 %v348_v19 }
  0xac   :  { %v148_v20 = vpop.f32.mrf.mxu0 }
  0xad   :  { %v149_v21 = vadd.f32 %v364_v18, %v148_v20 }
  0xaf   :  { %v153_v22 = vmul.f32 %v149_v21, %v149_v21 }
  0xb1   :  { %v155_v23 = vmul.f32 %v153_v22, %v149_v21 }
  0xb3   :  { %v157_v24 = vmul.f32 0.044715, %v155_v23 }
  0xb4   :  { %v150_v25 = vpop.f32.mrf.mxu0 }
  0xb5   :  { %v159_v26 = vadd.f32 %v157_v24, %v149_v21  ;;  %v151_v27 = vadd.f32 %v364_v18, %v150_v25 }
  0xb7   :  { %v154_v28 = vmul.f32 %v151_v27, %v151_v27  ;;  %v161_v29 = vmul.f32 0.7978846, %v159_v26 }
  0xb9   :  { %v156_v30 = vmul.f32 %v154_v28, %v151_v27  ;;  %366 = vtanh.f32 %v161_v29 }
  0xbb   :  { %v158_v31 = vmul.f32 0.044715, %v156_v30 }
  0xbd   :  { %v160_v32 = vadd.f32 %v158_v31, %v151_v27 }
  0xbf   :  { %v162_v33 = vmul.f32 0.7978846, %v160_v32  ;;  %v367_v34 = vpop.eup %366 }
  0xc0   :  { %v165_v35 = vadd.f32 1.0, %v367_v34 }
  0xc1   :  { %368 = vtanh.f32 %v162_v33 }
  0xc2   :  { %v167_v38 = vmul.f32 0.5, %v165_v35 }
  0xc4   :  { %v169_v40 = vmul.f32 %v167_v38, %v149_v21 }
  0xc7   :  { %v369_v36 = vpop.eup %368 }
  0xc8   :  { %v166_v37 = vadd.f32 1.0, %v369_v36 }
  0xca   :  { %v168_v39 = vmul.f32 0.5, %v166_v37 }
  0xcc   :  { %v170_v41 = vmul.f32 %v168_v39, %v151_v27 }
  0xce   :  { %v171_v42 = vpack.c.bf16 %v170_v41, %v169_v40 }
  0xd0   :  { %248 = vmatmul.bf16.vlgmr.msra.gmra.mxu1 %v171_v42 }
 0x14d   :  { %v249_v44 = vpop.f32.mrf.mxu1 }
 0x14e   :  { %v250_v45 = vadd.f32 %v365_v43, %v249_v44 }
 0x150   :  { %254 = vst [vmem:[#allocation8] sm:$0xff] %v250_v45 }
 0x155   :  { %v251_v46 = vpop.f32.mrf.mxu1 }
 0x156   :  { %v252_v47 = vadd.f32 %v365_v43, %v251_v46 }
 0x158   :  { %255 = vst [vmem:[#allocation8 + $0x8] sm:$0xff] %v252_v47 }
 0x159   :  { %268 = dma.vmem_to_hbm [thread:$0]  %s261_s13, 256, %s263_s16, [#allocation4], %s476_s30, %s476_s30, %s477_s6  }
 0x15a   :  { %470 = dma.done.wait [#allocation4], 256  }
 0x15b   :  { %471 = vsyncadd [#allocation4], 4294967040 }
 0x15c   :  { %273 = vsyncpa [#allocation3], 1 }
 0x15d   :  { %274 = vsyncpa [#allocation6], 1 }
 0x15e   :  { %275 = vsyncpa [#allocation4], 1 }

</bundles_post_ra>
